<compile_context>
chip_gen: v7x
topology: tpu7x:2x2x1
jax: 0.10.0
libtpu: 0.0.40
codegen_flags: <defaults>
</compile_context>

<pallas_src>
import functools

import jax
import jax.numpy as jnp
from jax.experimental import pallas as pl
from jax.experimental.pallas import tpu as pltpu

LANE = 128           # lane width (hardware)
MAX_BLK_ROWS = 512   # 512*128*4B = 256 KiB per f32 input tile
PAD_LOGIT = -100.0   # sigmoid(-100) ~ 0 with target 0 => exactly 0 loss


def _round_up(x, m):
    return (x + m - 1) // m * m


def _focal_loss_kernel(o_ref, t_ref, out_ref, acc_ref, *, alpha, gamma):
    i = pl.program_id(1)

    @pl.when(i == 0)
    def _():
        acc_ref[...] = jnp.zeros_like(acc_ref)

    x = o_ref[...].astype(jnp.float32)
    t = t_ref[...].astype(jnp.float32)

    probs = jax.nn.sigmoid(x)

    # F.binary_cross_entropy clamps log terms at -100 (PyTorch semantics).
    log_p = jnp.maximum(jnp.log(probs), -100.0)
    log_1mp = jnp.maximum(jnp.log(1.0 - probs), -100.0)
    bce = -(t * log_p + (1.0 - t) * log_1mp)

    # 1 - pt, where pt = where(t == 1, probs, 1 - probs)
    one_m_pt = jnp.where(t == 1.0, 1.0 - probs, probs)

    # (1 - pt) ** gamma — keep the EUP load minimal.
    if gamma == 2.0:          # default: just a multiply
        pow_term = one_m_pt * one_m_pt
    elif gamma == 1.0:
        pow_term = one_m_pt
    elif gamma == 0.0:
        pow_term = jnp.ones_like(one_m_pt)
    else:
        # Reuse the already-clamped logs: log(1 - pt) == where(t==1, log_1mp, log_p)
        log_one_m_pt = jnp.where(t == 1.0, log_1mp, log_p)
        pow_term = jnp.exp(gamma * log_one_m_pt)

    fl = alpha * pow_term * bce

    # Fold the (blk_rows, 128) block to one (8, 128) vreg — pure VALU adds,
    # no cross-lane (XLU) work inside the hot loop.
    acc_ref[...] += jnp.sum(fl.reshape(-1, 8, LANE), axis=0)

    @pl.when(i == pl.num_programs(1) - 1)
    def _():
        col = jnp.sum(acc_ref[...], axis=0, keepdims=True)   # (1, LANE)
        tot = jnp.sum(col, axis=1, keepdims=True)            # (1, 1)
        out_ref[...] = tot.reshape(1, 1, 1)


def focal_loss(outputs, targets, alpha=0.25, gamma=2.0):
    """Focal loss (mean) over arbitrarily-shaped matching outputs/targets."""
    assert outputs.shape == targets.shape
    n = outputs.size

    rows_needed = pl.cdiv(n, LANE)
    if rows_needed <= MAX_BLK_ROWS:
        blk_rows = max(8, _round_up(rows_needed, 8))
        nsplit = 1
        blocks_per_split = 1
    else:
        blk_rows = MAX_BLK_ROWS
        nsplit = 2  # 2-way 'parallel' split -> both v7x TensorCores
        total_blocks = _round_up(pl.cdiv(rows_needed, blk_rows), nsplit)
        blocks_per_split = total_blocks // nsplit

    padded_rows = blk_rows * nsplit * blocks_per_split
    pad = padded_rows * LANE - n

    flat_o = outputs.reshape(-1)
    flat_t = targets.reshape(-1)
    if pad:
        # Sentinel padding: logits=-100 (probs ~ 0), targets=0
        #   => bce = 0 and (1-pt)**gamma ~ 0, so padded elements add exactly 0.
        flat_o = jnp.pad(flat_o, (0, pad), constant_values=PAD_LOGIT)
        flat_t = jnp.pad(flat_t, (0, pad), constant_values=0.0)

    o2 = flat_o.reshape(padded_rows, LANE)
    t2 = flat_t.reshape(padded_rows, LANE)

    kernel = functools.partial(
        _focal_loss_kernel, alpha=float(alpha), gamma=float(gamma))

    n_padded = padded_rows * LANE
    cost = pl.CostEstimate(
        flops=12 * n_padded,
        transcendentals=4 * n_padded,
        bytes_accessed=int(o2.size) * o2.dtype.itemsize
        + int(t2.size) * t2.dtype.itemsize
        + 4 * nsplit,
    )

    partials = pl.pallas_call(
        kernel,
        out_shape=jax.ShapeDtypeStruct((nsplit, 1, 1), jnp.float32),
        grid_spec=pltpu.PrefetchScalarGridSpec(
            num_scalar_prefetch=0,
            grid=(nsplit, blocks_per_split),
            in_specs=[
                pl.BlockSpec((blk_rows, LANE),
                             lambda s, i: (s * blocks_per_split + i, 0)),
                pl.BlockSpec((blk_rows, LANE),
                             lambda s, i: (s * blocks_per_split + i, 0)),
            ],
            out_specs=pl.BlockSpec((1, 1, 1), lambda s, i: (s, 0, 0)),
            scratch_shapes=[pltpu.VMEM((8, LANE), jnp.float32)],
        ),
        compiler_params=pltpu.CompilerParams(
            dimension_semantics=("parallel", "arbitrary"),
        ),
        cost_estimate=cost,
    )(o2, t2)

    return jnp.sum(partials) / jnp.float32(n)


def focal_loss_ref(outputs, targets, alpha=0.25, gamma=2.0):
    """Pure-JAX reference mirroring the PyTorch module."""
    probs = jax.nn.sigmoid(outputs.astype(jnp.float32))
    t = targets.astype(jnp.float32)
    log_p = jnp.maximum(jnp.log(probs), -100.0)
    log_1mp = jnp.maximum(jnp.log(1.0 - probs), -100.0)
    bce = -(t * log_p + (1.0 - t) * log_1mp)
    pt = jnp.where(t == 1.0, probs, 1.0 - probs)
    return jnp.mean(alpha * (1.0 - pt) ** gamma * bce)


if __name__ == "__main__":
    key = jax.random.PRNGKey(0)

    test_shapes = [
        (2, 4, 16, 16),    # spec-sized NCHW: aligned, single block
        (3, 5, 7, 11),     # ragged size -> exercises sentinel padding
        (2, 4, 160, 160),  # multi-block + 2-way 'parallel' split + padding
    ]
    for idx, shape in enumerate(test_shapes):
        k1, k2 = jax.random.split(jax.random.fold_in(key, idx))
        outputs = jax.random.normal(k1, shape, dtype=jnp.float32) * 2.0
        targets = jax.random.bernoulli(k2, 0.3, shape).astype(jnp.float32)

        loss = jax.block_until_ready(focal_loss(outputs, targets,
                                                alpha=0.25, gamma=2.0))
        ref = focal_loss_ref(outputs, targets, alpha=0.25, gamma=2.0)
        assert jnp.allclose(loss, ref, rtol=1e-4, atol=1e-7), (shape, loss, ref)

    print("KERNEL_OK")
</pallas_src>

<mosaic_0001>
module attributes {stable_mosaic.version = 11 : i64} {
  func.func @_focal_loss_kernel(%arg0: i32, %arg1: i32, %arg2: memref<16x128xf32, #tpu.memory_space<vmem>>, %arg3: memref<16x128xf32, #tpu.memory_space<vmem>>, %arg4: memref<1x1x1xf32, #tpu.memory_space<vmem>>, %arg5: memref<8x128xf32, #tpu.memory_space<vmem>>) attributes {dimension_semantics = [#tpu.dimension_semantics<parallel>, #tpu.dimension_semantics<arbitrary>], iteration_bounds = array<i64: 1, 1>, scalar_prefetch = 0 : i64, scratch_operands = 1 : i64, tpu.core_type = #tpu.core_type<tc>, window_params = [{transform_indices = @transform_0, window_bounds = array<i64: 16, 128>}, {transform_indices = @transform_1, window_bounds = array<i64: 16, 128>}, {transform_indices = @transform_2, window_bounds = array<i64: 1, 1, 1>}]} {
    %c0_i32 = arith.constant 0 : i32
    %0 = arith.cmpi eq, %arg1, %c0_i32 : i32
    %1 = arith.extui %0 : i1 to i32
    %c0_i32_0 = arith.constant 0 : i32
    %2 = arith.cmpi ne, %1, %c0_i32_0 : i32
    scf.if %2 {
      %cst_19 = arith.constant 0.000000e+00 : f32
      %42 = vector.broadcast %cst_19 : f32 to vector<8x128xf32>
      %c0_20 = arith.constant 0 : index
      %c0_21 = arith.constant 0 : index
      %43 = vector.load %arg5[%c0_20, %c0_21] : memref<8x128xf32, #tpu.memory_space<vmem>>, vector<8x128xf32>
      tpu.vector_store %arg5[%c0_20, %c0_21], %42 {strides = array<i32>} : memref<8x128xf32, #tpu.memory_space<vmem>>, vector<8x128xf32>,
    } else {
    }
    %c0 = arith.constant 0 : index
    %c0_1 = arith.constant 0 : index
    %3 = vector.load %arg2[%c0, %c0_1] : memref<16x128xf32, #tpu.memory_space<vmem>>, vector<16x128xf32>
    %c0_2 = arith.constant 0 : index
    %c0_3 = arith.constant 0 : index
    %4 = vector.load %arg3[%c0_2, %c0_3] : memref<16x128xf32, #tpu.memory_space<vmem>>, vector<16x128xf32>
    %5 = arith.negf %3 : vector<16x128xf32>
    %6 = math.exp %5 : vector<16x128xf32>
    %cst = arith.constant 1.000000e+00 : f32
    %7 = vector.broadcast %cst : f32 to vector<16x128xf32>
    %8 = arith.addf %7, %6 : vector<16x128xf32>
    %9 = arith.divf %7, %8 : vector<16x128xf32>
    %10 = math.log %9 : vector<16x128xf32>
    %cst_4 = arith.constant -1.000000e+02 : f32
    %11 = vector.broadcast %cst_4 : f32 to vector<16x128xf32>
    %12 = arith.maximumf %10, %11 : vector<16x128xf32>
    %cst_5 = arith.constant 1.000000e+00 : f32
    %13 = vector.broadcast %cst_5 : f32 to vector<16x128xf32>
    %14 = arith.subf %13, %9 : vector<16x128xf32>
    %15 = math.log %14 : vector<16x128xf32>
    %cst_6 = arith.constant -1.000000e+02 : f32
    %16 = vector.broadcast %cst_6 : f32 to vector<16x128xf32>
    %17 = arith.maximumf %15, %16 : vector<16x128xf32>
    %18 = arith.mulf %4, %12 : vector<16x128xf32>
    %cst_7 = arith.constant 1.000000e+00 : f32
    %19 = vector.broadcast %cst_7 : f32 to vector<16x128xf32>
    %20 = arith.subf %19, %4 : vector<16x128xf32>
    %21 = arith.mulf %20, %17 : vector<16x128xf32>
    %22 = arith.addf %18, %21 : vector<16x128xf32>
    %cst_8 = arith.constant 0.000000e+00 : f32
    %23 = vector.broadcast %cst_8 : f32 to vector<16x128xf32>
    %24 = arith.subf %23, %22 : vector<16x128xf32>
    %cst_9 = arith.constant 1.000000e+00 : f32
    %25 = vector.broadcast %cst_9 : f32 to vector<16x128xf32>
    %26 = arith.cmpf oeq, %4, %25 : vector<16x128xf32>
    %cst_10 = arith.constant 1.000000e+00 : f32
    %27 = vector.broadcast %cst_10 : f32 to vector<16x128xf32>
    %28 = arith.subf %27, %9 : vector<16x128xf32>
    %29 = arith.select %26, %28, %9 : vector<16x128xi1>, vector<16x128xf32>
    %30 = arith.mulf %29, %29 : vector<16x128xf32>
    %cst_11 = arith.constant 2.500000e-01 : f32
    %31 = vector.broadcast %cst_11 : f32 to vector<16x128xf32>
    %32 = arith.mulf %31, %30 : vector<16x128xf32>
    %33 = arith.mulf %32, %24 : vector<16x128xf32>
    %c0_12 = arith.constant 0 : index
    %c0_13 = arith.constant 0 : index
    %34 = vector.load %arg5[%c0_12, %c0_13] : memref<8x128xf32, #tpu.memory_space<vmem>>, vector<8x128xf32>
    %35 = vector.shape_cast %33 : vector<16x128xf32> to vector<2x8x128xf32>
    %cst_14 = arith.constant dense<0.000000e+00> : vector<8x128xf32>
    %36 = vector.multi_reduction <add>, %35, %cst_14 [0] : vector<2x8x128xf32> to vector<8x128xf32>
    %37 = arith.addf %34, %36 : vector<8x128xf32>
    %c0_15 = arith.constant 0 : index
    %c0_16 = arith.constant 0 : index
    %38 = vector.load %arg5[%c0_15, %c0_16] : memref<8x128xf32, #tpu.memory_space<vmem>>, vector<8x128xf32>
    tpu.vector_store %arg5[%c0_15, %c0_16], %37 {strides = array<i32>} : memref<8x128xf32, #tpu.memory_space<vmem>>, vector<8x128xf32>,
    %c0_i32_17 = arith.constant 0 : i32
    %39 = arith.cmpi eq, %arg1, %c0_i32_17 : i32
    %40 = arith.extui %39 : i1 to i32
    %c0_i32_18 = arith.constant 0 : i32
    %41 = arith.cmpi ne, %40, %c0_i32_18 : i32
    scf.if %41 {
      %c0_19 = arith.constant 0 : index
      %c0_20 = arith.constant 0 : index
      %42 = vector.load %arg5[%c0_19, %c0_20] : memref<8x128xf32, #tpu.memory_space<vmem>>, vector<8x128xf32>
      %cst_21 = arith.constant dense<0.000000e+00> : vector<128xf32>
      %43 = vector.multi_reduction <add>, %42, %cst_21 [0] : vector<8x128xf32> to vector<128xf32>
      %44 = vector.shape_cast %43 : vector<128xf32> to vector<1x128xf32>
      %cst_22 = arith.constant dense<0.000000e+00> : vector<1xf32>
      %45 = vector.multi_reduction <add>, %44, %cst_22 [1] : vector<1x128xf32> to vector<1xf32>
      %46 = vector.shape_cast %45 : vector<1xf32> to vector<1x1xf32>
      %47 = vector.shape_cast %46 : vector<1x1xf32> to vector<1x1x1xf32>
      %c0_23 = arith.constant 0 : index
      %c0_24 = arith.constant 0 : index
      %c0_25 = arith.constant 0 : index
      %48 = vector.load %arg4[%c0_23, %c0_24, %c0_25] : memref<1x1x1xf32, #tpu.memory_space<vmem>>, vector<1x1x1xf32>
      tpu.vector_store %arg4[%c0_23, %c0_24, %c0_25], %47 {strides = array<i32>} : memref<1x1x1xf32, #tpu.memory_space<vmem>>, vector<1x1x1xf32>,
    } else {
    }
    return
  }
  func.func @transform_0(%arg0: i32, %arg1: i32) -> (i32, i32) {
    %c1_i32 = arith.constant 1 : i32
    %0 = arith.muli %arg0, %c1_i32 : i32
    %1 = arith.addi %0, %arg1 : i32
    %c0_i32 = arith.constant 0 : i32
    %c0_i32_0 = arith.constant 0 : i32
    return %1, %c0_i32 : i32, i32
  }
  func.func @transform_1(%arg0: i32, %arg1: i32) -> (i32, i32) {
    %c1_i32 = arith.constant 1 : i32
    %0 = arith.muli %arg0, %c1_i32 : i32
    %1 = arith.addi %0, %arg1 : i32
    %c0_i32 = arith.constant 0 : i32
    %c0_i32_0 = arith.constant 0 : i32
    return %1, %c0_i32 : i32, i32
  }
  func.func @transform_2(%arg0: i32, %arg1: i32) -> (i32, i32, i32) {
    %c0_i32 = arith.constant 0 : i32
    %c0_i32_0 = arith.constant 0 : i32
    %c0_i32_1 = arith.constant 0 : i32
    return %arg0, %c0_i32, %c0_i32_0 : i32, i32, i32
  }
}

</mosaic_0001>

<bundles_post_ra>
// kernel: tpu_custom_call.1
= control target key start
LH: loop header
LB: loop body
LE: loop exit
PB: predicated region body
PF: predicated region fallthrough
CT: control target
= control target key end

     0   :  { %7 = vsyncpa [#allocation4], 0  ;;  %s292_s0 = inlined_call_operand.hbm [shape: f32[16,128], index: 0, kind: input, shape index: {}]   ;;  %s293_s1 = inlined_call_operand.hbm [shape: f32[16,128], index: 1, kind: input, shape index: {}]   ;;  %s294_s2 = inlined_call_operand.hbm [shape: f32[1,1,1], index: 2, kind: output, shape index: {}]  }
   0x1   :  { %8 = vsyncpa [#allocation7], 0 }
   0x2   :  { %9 = vsyncpa [#allocation5], 0  ;;  %s236_s9 = smov [#allocation3]   ;;  %s164_s13 = scalar_lea.hbm %s292_s0, 256 }
   0x3   :  { %s19_s10 = sshll.u32 %s236_s9, 4  ;;  %p165_p0 = scmp.ne.s32.totalorder %s292_s0, %s164_s13  ;;  %s20_s10 = int_to_ptr.vmem [resolvable:$true] %s19_s10 }
   0x4   :  { %p168_p1 = scmp.lt.u32.totalorder %s164_s13, %s292_s0 }
   0x6   :  { %p170_p2 = pnand %p168_p1, %p165_p0 }
   0x8   :  { %173 = shalt.err (!%p170_p2)
}
   0x9   :  { %s174_s18 = scalar_lea.vmem %s20_s10, 256  ;;  %p179_p4 = scmp.lt.s32.totalorder %s20_s10, %s20_s10 }
   0xa   :  { %p175_p3 = scmp.ne.s32.totalorder %s20_s10, %s174_s18  ;;  %p180_p5 = scmp.lt.s32.totalorder %s174_s18, %s174_s18 }
   0xc   :  { %p181_p6 = por %p180_p5, %p179_p4 }
   0xe   :  { %p182_p7 = pnand %p181_p6, %p175_p3 }
  0x10   :  { %185 = shalt.err (!%p182_p7)
}
  0x11   :  { %s237_s19 = smov 128   ;;  %s238_s20 = smov 8  }
  0x12   :  { %25 = dma.hbm_to_vmem [thread:$0]  %s292_s0, 256, %s20_s10, [#allocation4], %s237_s19, %s237_s19, %s238_s20  }
  0x13   :  { %s239_s23 = smov [#allocation6]   ;;  %s186_s27 = scalar_lea.hbm %s293_s1, 256 }
  0x14   :  { %s35_s24 = sshll.u32 %s239_s23, 4  ;;  %p187_p8 = scmp.ne.s32.totalorder %s293_s1, %s186_s27  ;;  %s36_s24 = int_to_ptr.vmem [resolvable:$true] %s35_s24 }
  0x15   :  { %p190_p9 = scmp.lt.u32.totalorder %s186_s27, %s293_s1 }
  0x17   :  { %p192_p10 = pnand %p190_p9, %p187_p8 }
  0x19   :  { %195 = shalt.err (!%p192_p10)
}
  0x1a   :  { %s196_s4 = scalar_lea.vmem %s36_s24, 256  ;;  %p201_p12 = scmp.lt.s32.totalorder %s36_s24, %s36_s24 }
  0x1b   :  { %p197_p11 = scmp.ne.s32.totalorder %s36_s24, %s196_s4  ;;  %p202_p13 = scmp.lt.s32.totalorder %s196_s4, %s196_s4 }
  0x1d   :  { %p203_p0 = por %p202_p13, %p201_p12 }
  0x1f   :  { %p204_p1 = pnand %p203_p0, %p197_p11 }
  0x21   :  { %207 = shalt.err (!%p204_p1)
}
  0x22   :  { %41 = dma.hbm_to_vmem [thread:$0]  %s293_s1, 256, %s36_s24, [#allocation7], %s237_s19, %s237_s19, %s238_s20  }
  0x23   :  { %230 = dma.done.wait [#allocation4], 256  }
  0x24   :  { %231 = vsyncadd [#allocation4], 4294967040 }
  0x25   :  { %232 = dma.done.wait [#allocation7], 256  }
  0x26   :  { %233 = vsyncadd [#allocation7], 4294967040  ;;  %v57_v0 = vld [vmem:[#allocation3] sm:$0xff]  ;;  %v58_v1 = vld [vmem:[#allocation3 + $0x8] sm:$0xff]  ;;  %s240_s1 = smov [#allocation8]   ;;  %vm123_vm2 = vcmask 0  }
  0x27   :  { %v141_v2 = vmul.f32 -1.442695, %v57_v0  ;;  %v142_v3 = vmul.f32 -1.442695, %v58_v1  ;;  %v59_v12 = vld [vmem:[#allocation6] sm:$0xff]  ;;  %v60_v13 = vld [vmem:[#allocation6 + $0x8] sm:$0xff] }
  0x28   :  { %vm97_vm0 = vcmp.eq.f32.partialorder %v59_v12, 1.0  ;;  %vm98_vm1 = vcmp.eq.f32.partialorder %v60_v13, 1.0  ;;  %v89_v23 = vsub.f32 1.0, %v59_v12  ;;  %v90_v27 = vsub.f32 1.0, %v60_v13  ;;  %s131_s6 = sshll.u32 %s240_s1, 4  ;;  %s132_s6 = int_to_ptr.vmem [resolvable:$true] %s131_s6 }
  0x29   :  { %148 = vpow2.f32 %v141_v2  ;;  %s208_s7 = scalar_lea.vmem %s132_s6, 16  ;;  %s212_s8 = scalar_lea.vmem %s132_s6, 32 }
  0x2a   :  { %150 = vpow2.f32 %v142_v3  ;;  %p209_p2 = scmp.ne.s32.totalorder %s132_s6, %s208_s7  ;;  %p213_p3 = scmp.lt.s32.totalorder %s132_s6, %s132_s6 }
  0x2b   :  { %p214_p4 = scmp.lt.s32.totalorder %s212_s8, %s208_s7 }
  0x2d   :  { %p215_p5 = por %p214_p4, %p213_p3 }
  0x2f   :  { %p216_p6 = pnand %p215_p5, %p209_p2 }
  0x33   :  { %v149_v4 = vpop.eup %148 }
  0x34   :  { %v151_v5 = vpop.eup %150  ;;  %v67_v6 = vadd.f32 1.0, %v149_v4 }
  0x35   :  { %v68_v7 = vadd.f32 1.0, %v151_v5 }
  0x36   :  { %152 = vrcp.f32 %v67_v6 }
  0x37   :  { %154 = vrcp.f32 %v68_v7 }
  0x40   :  { %v153_v8 = vpop.eup %152 }
  0x41   :  { %v155_v9 = vpop.eup %154  ;;  %156 = vlog2.f32 %v153_v8  ;;  %v79_v10 = vsub.f32 1.0, %v153_v8 }
  0x42   :  { %158 = vlog2.f32 %v155_v9  ;;  %v80_v11 = vsub.f32 1.0, %v155_v9 }
  0x43   :  { %160 = vlog2.f32 %v79_v10  ;;  %v99_v19 = vsel %vm97_vm0, %v79_v10, %v153_v8 }
  0x44   :  { %162 = vlog2.f32 %v80_v11  ;;  %v100_v24 = vsel %vm98_vm1, %v80_v11, %v155_v9  ;;  %v101_v30 = vmul.f32 %v99_v19, %v99_v19 }
  0x45   :  { %v102_v33 = vmul.f32 %v100_v24, %v100_v24 }
  0x46   :  { %v103_v37 = vmul.f32 0.25, %v101_v30 }
  0x47   :  { %v104_v39 = vmul.f32 0.25, %v102_v33 }
  0x4b   :  { %v157_v14 = vpop.eup %156 }
  0x4c   :  { %v159_v15 = vpop.eup %158  ;;  %v74_v16 = vmul.f32 0.6931472, %v157_v14 }
  0x4d   :  { %v161_v17 = vpop.eup %160  ;;  %v76_v18 = vmul.f32 0.6931472, %v159_v15 }
  0x4e   :  { %v163_v20 = vpop.eup %162  ;;  %v77_v21 = vmax.f32 %v74_v16, -100.0  ;;  %v82_v22 = vmul.f32 0.6931472, %v161_v17 }
  0x4f   :  { %v78_v25 = vmax.f32 %v76_v18, -100.0  ;;  %v84_v26 = vmul.f32 0.6931472, %v163_v20 }
  0x50   :  { %v85_v28 = vmax.f32 %v82_v22, -100.0  ;;  %v87_v29 = vmul.f32 %v77_v21, %v59_v12 }
  0x51   :  { %v86_v31 = vmax.f32 %v84_v26, -100.0  ;;  %v88_v32 = vmul.f32 %v78_v25, %v60_v13 }
  0x52   :  { %v91_v34 = vmul.f32 %v89_v23, %v85_v28 }
  0x53   :  { %v92_v35 = vmul.f32 %v90_v27, %v86_v31 }
  0x54   :  { %v93_v36 = vadd.f32 %v91_v34, %v87_v29 }
  0x55   :  { %v94_v38 = vadd.f32 %v92_v35, %v88_v32 }
  0x56   :  { %v95_v40 = vsub.f32 0.0, %v93_v36 }
  0x57   :  { %v96_v41 = vsub.f32 0.0, %v94_v38 }
  0x58   :  { %v105_v42 = vmul.f32 %v103_v37, %v95_v40 }
  0x59   :  { %v106_v43 = vmul.f32 %v104_v39, %v96_v41 }
  0x5b   :  { %v108_v44 = vadd.f32 %v106_v43, %v105_v42 }
  0x5d   :  { %v115_v45 = vrot.slane %v108_v44, 4 }
  0x5f   :  { %v116_v46 = vadd.f32 %v115_v45, %v108_v44 }
  0x61   :  { %v117_v47 = vrot.slane %v116_v46, 2 }
  0x63   :  { %v118_v48 = vadd.f32 %v117_v47, %v116_v46 }
  0x65   :  { %v119_v49 = vrot.slane %v118_v48, 1 }
  0x67   :  { %v120_v50 = vadd.f32 %v119_v49, %v118_v48 }
  0x69   :  { %121 = vadd.xlane.f32.xlu0 %v120_v50 }
  0xf6   :  { %v122_v51 = vpop.xlane.xlu0 %121 }
  0xf7   :  { %124 = vst.msk [vmem:[#allocation8] sm:$0x1] %vm123_vm2, %v122_v51 }
  0xf8   :  { %219 = shalt.err (!%p216_p6)
}
  0xf9   :  { %s220_s11 = scalar_lea.hbm %s294_s2, 16 }
  0xfa   :  { %p221_p7 = scmp.ne.s32.totalorder %s294_s2, %s220_s11  ;;  %p224_p8 = scmp.lt.u32.totalorder %s220_s11, %s294_s2 }
  0xfc   :  { %p226_p9 = pnand %p224_p8, %p221_p7 }
  0xfe   :  { %229 = shalt.err (!%p226_p9)
}
  0xff   :  { %134 = dma.vmem_to_hbm [thread:$0]  %s132_s6, 16, %s294_s2, [#allocation5]  }
 0x100   :  { %234 = dma.done.wait [#allocation5], 16  }
 0x101   :  { %235 = vsyncadd [#allocation5], 4294967280 }
 0x102   :  { %138 = vsyncpa [#allocation4], 1 }
 0x103   :  { %139 = vsyncpa [#allocation7], 1 }
 0x104   :  { %140 = vsyncpa [#allocation5], 1 }

</bundles_post_ra>
